<compile_context>
chip_gen: v6e
topology: v6e:2x2x1
jax: 0.10.0
libtpu: 0.0.40
codegen_flags: <defaults>
</compile_context>

<pallas_src>
from functools import partial

import jax
import jax.numpy as jnp
from jax.experimental import pallas as pl
from jax.experimental.pallas import tpu as pltpu


ALPHA = 0.1   # LeakyReLU negative slope
HIDDEN = 256  # hidden width of the MLP


def _round_up(n, m):
    return ((n + m - 1) // m) * m


def ee_delta_encoder_kernel(x_ref, w1_ref, b1_ref, w2_ref, b2_ref,
                            w3_ref, b3_ref, out_ref):
    """3-layer MLP on one (TM, ee_dim) batch tile; weights resident in VMEM."""
    cd = w1_ref.dtype  # matmul operand dtype (bf16); accumulate in f32

    # Layer 1: (TM, ee_dim) @ (ee_dim, 256) + (1, 256)
    h = jnp.dot(x_ref[...].astype(cd), w1_ref[...],
                preferred_element_type=jnp.float32) + b1_ref[...]
    h = jnp.where(h > 0, h, ALPHA * h)                      # f32 VPU path

    # Layer 2: (TM, 256) @ (256, 256) + (1, 256)
    h = jnp.dot(h.astype(cd), w2_ref[...],
                preferred_element_type=jnp.float32) + b2_ref[...]
    h = jnp.where(h > 0, h, ALPHA * h)

    # Layer 3 fused: (TM, 256) @ (256, 2*z_dim) + (1, 2*z_dim) -> single output
    out = jnp.dot(h.astype(cd), w3_ref[...],
                  preferred_element_type=jnp.float32) + b3_ref[...]
    out_ref[...] = out.astype(out_ref.dtype)


def _tile_plan(B, tm):
    """8-aligned batch tile; >= 2 balanced tiles when B > 8 (v7x megacore)."""
    B8 = _round_up(B, 8)
    if B8 <= 8:
        return B8, 1
    n_tiles = max(2, pl.cdiv(B8, tm))               # both TensorCores get work
    tm_eff = _round_up(pl.cdiv(B8, n_tiles), 8)     # balanced, minimal padding
    return tm_eff, n_tiles


def _vmem_limit_bytes(tm_eff, ee_dim, z_dim):
    """Conservative scoped-VMEM estimate (2x headroom, 32..48 MiB clamp)."""
    f32, bf16, lane = 4, 2, 128
    x_blk = 2 * tm_eff * max(ee_dim, lane) * f32            # double-buffered in
    out_blk = 2 * tm_eff * max(2 * z_dim, lane) * f32        # double-buffered out
    w = 2 * (ee_dim * HIDDEN + HIDDEN * HIDDEN + HIDDEN * 2 * z_dim) * bf16
    b = 2 * 8 * (2 * HIDDEN + max(2 * z_dim, lane)) * f32
    inter = 4 * tm_eff * HIDDEN * f32                        # h temporaries
    est = x_blk + out_blk + w + b + inter
    return int(min(max(2 * est, 32 << 20), 48 << 20))


@partial(jax.jit, static_argnums=(2, 3))
def ee_delta_encoder_forward(x, params, z_dim, tm=1024):
    """Batch-tiled Pallas MLP; weights VMEM-resident across the grid."""
    w1, b1, w2, b2, w3, b3 = params
    B, ee_dim = x.shape

    tm_eff, n_tiles = _tile_plan(B, tm)
    B_pad = tm_eff * n_tiles
    if B_pad != B:
        x = jnp.pad(x, ((0, B_pad - B), (0, 0)))

    # Constant index_map -> block never changes -> DMA'd once, stays resident.
    resident = lambda a: pl.BlockSpec(a.shape, lambda i: (0,) * a.ndim)

    out = pl.pallas_call(
        ee_delta_encoder_kernel,
        out_shape=jax.ShapeDtypeStruct((B_pad, 2 * z_dim), jnp.float32),
        grid=(n_tiles,),
        in_specs=[pl.BlockSpec((tm_eff, ee_dim), lambda i: (i, 0)),  # x: tiled
                  resident(w1), resident(b1),
                  resident(w2), resident(b2),
                  resident(w3), resident(b3)],
        out_specs=pl.BlockSpec((tm_eff, 2 * z_dim), lambda i: (i, 0)),
        compiler_params=pltpu.CompilerParams(
            dimension_semantics=("parallel",),
            vmem_limit_bytes=_vmem_limit_bytes(tm_eff, ee_dim, z_dim)),
    )(x, w1, b1, w2, b2, w3, b3)

    out = out[:B]
    # torch.split(layers(x).unsqueeze(-1), z_dim, dim=1) -> two (B, z_dim, 1).
    return out[:, :z_dim, None], out[:, z_dim:, None]


def init_params(key, ee_dim, z_dim, weight_dtype=jnp.bfloat16):
    """Deterministic init (Kaiming-uniform-ish, like nn.Linear defaults).

    Weights stored in bf16 (full-rate MXU path); biases stay f32 since they
    feed the f32 accumulator / elementwise path.
    """
    dims = [(ee_dim, HIDDEN), (HIDDEN, HIDDEN), (HIDDEN, 2 * z_dim)]
    params = []
    for fan_in, fan_out in dims:
        kw, kb, key = jax.random.split(key, 3)
        bound = 1.0 / jnp.sqrt(float(fan_in))
        w_t = jax.random.uniform(kw, (fan_in, fan_out), jnp.float32, -bound, bound)
        b = jax.random.uniform(kb, (1, fan_out), jnp.float32, -bound, bound)
        params.extend([w_t.astype(weight_dtype), b])
    return tuple(params)


def reference_forward(x, params, z_dim):
    """Pure-JAX reference (same bf16 matmul operands, f32 accumulation)."""
    w1, b1, w2, b2, w3, b3 = params
    cd = w1.dtype
    h = jnp.dot(x.astype(cd), w1, preferred_element_type=jnp.float32) + b1
    h = jnp.where(h > 0, h, ALPHA * h)
    h = jnp.dot(h.astype(cd), w2, preferred_element_type=jnp.float32) + b2
    h = jnp.where(h > 0, h, ALPHA * h)
    out = jnp.dot(h.astype(cd), w3, preferred_element_type=jnp.float32) + b3
    out = out[:, :, None]
    return out[:, :z_dim, :], out[:, z_dim:, :]


if __name__ == "__main__":
    B, ee_dim, z_dim = 8, 16, 32  # small example; kernel scales B via the grid

    key = jax.random.PRNGKey(0)
    kx, kp = jax.random.split(key)
    x = jax.random.normal(kx, (B, ee_dim), jnp.float32)
    params = init_params(kp, ee_dim, z_dim)

    mu, logvar = ee_delta_encoder_forward(x, params, z_dim)
    jax.block_until_ready((mu, logvar))

    assert mu.shape == (B, z_dim, 1) and logvar.shape == (B, z_dim, 1)

    mu_ref, logvar_ref = reference_forward(x, params, z_dim)
    assert jnp.allclose(mu, mu_ref, atol=1e-3, rtol=1e-3)
    assert jnp.allclose(logvar, logvar_ref, atol=1e-3, rtol=1e-3)

    print("KERNEL_OK")
</pallas_src>

<mosaic_0001>
module attributes {stable_mosaic.version = 11 : i64} {
  func.func @ee_delta_encoder_kernel(%arg0: i32, %arg1: memref<8x16xf32, #tpu.memory_space<vmem>>, %arg2: memref<16x256xbf16, #tpu.memory_space<vmem>>, %arg3: memref<1x256xf32, #tpu.memory_space<vmem>>, %arg4: memref<256x256xbf16, #tpu.memory_space<vmem>>, %arg5: memref<1x256xf32, #tpu.memory_space<vmem>>, %arg6: memref<256x64xbf16, #tpu.memory_space<vmem>>, %arg7: memref<1x64xf32, #tpu.memory_space<vmem>>, %arg8: memref<8x64xf32, #tpu.memory_space<vmem>>) attributes {dimension_semantics = [#tpu.dimension_semantics<parallel>], iteration_bounds = array<i64: 1>, scalar_prefetch = 0 : i64, scratch_operands = 0 : i64, tpu.core_type = #tpu.core_type<tc>, window_params = [{transform_indices = @transform_0, window_bounds = array<i64: 8, 16>}, {pipeline_mode = #tpu.pipeline_mode<synchronous>, transform_indices = @transform_1, window_bounds = array<i64: 16, 256>}, {pipeline_mode = #tpu.pipeline_mode<synchronous>, transform_indices = @transform_2, window_bounds = array<i64: 1, 256>}, {pipeline_mode = #tpu.pipeline_mode<synchronous>, transform_indices = @transform_3, window_bounds = array<i64: 256, 256>}, {pipeline_mode = #tpu.pipeline_mode<synchronous>, transform_indices = @transform_4, window_bounds = array<i64: 1, 256>}, {pipeline_mode = #tpu.pipeline_mode<synchronous>, transform_indices = @transform_5, window_bounds = array<i64: 256, 64>}, {pipeline_mode = #tpu.pipeline_mode<synchronous>, transform_indices = @transform_6, window_bounds = array<i64: 1, 64>}, {transform_indices = @transform_7, window_bounds = array<i64: 8, 64>}]} {
    %c0 = arith.constant 0 : index
    %c0_0 = arith.constant 0 : index
    %0 = vector.load %arg1[%c0, %c0_0] : memref<8x16xf32, #tpu.memory_space<vmem>>, vector<8x16xf32>
    %1 = arith.truncf %0 : vector<8x16xf32> to vector<8x16xbf16>
    %c0_1 = arith.constant 0 : index
    %c0_2 = arith.constant 0 : index
    %2 = vector.load %arg2[%c0_1, %c0_2] : memref<16x256xbf16, #tpu.memory_space<vmem>>, vector<16x256xbf16>
    %cst = arith.constant dense<0.000000e+00> : vector<8x256xf32>
    %3 = tpu.matmul %1, %2, %cst {dimension_numbers = #tpu.dot_dimension_numbers<[1], [0], [0], [1], [0, 0, 1, 1], [], []>} : vector<8x16xbf16>, vector<16x256xbf16>, vector<8x256xf32> -> vector<8x256xf32>
    %c0_3 = arith.constant 0 : index
    %c0_4 = arith.constant 0 : index
    %4 = vector.load %arg3[%c0_3, %c0_4] : memref<1x256xf32, #tpu.memory_space<vmem>>, vector<1x256xf32>
    %5 = vector.broadcast %4 : vector<1x256xf32> to vector<8x256xf32>
    %6 = arith.addf %3, %5 : vector<8x256xf32>
    %cst_5 = arith.constant 0.000000e+00 : f32
    %7 = vector.broadcast %cst_5 : f32 to vector<8x256xf32>
    %8 = arith.cmpf ogt, %6, %7 : vector<8x256xf32>
    %cst_6 = arith.constant 1.000000e-01 : f32
    %9 = vector.broadcast %cst_6 : f32 to vector<8x256xf32>
    %10 = arith.mulf %9, %6 : vector<8x256xf32>
    %11 = arith.select %8, %6, %10 : vector<8x256xi1>, vector<8x256xf32>
    %12 = arith.truncf %11 : vector<8x256xf32> to vector<8x256xbf16>
    %c0_7 = arith.constant 0 : index
    %c0_8 = arith.constant 0 : index
    %13 = vector.load %arg4[%c0_7, %c0_8] : memref<256x256xbf16, #tpu.memory_space<vmem>>, vector<256x256xbf16>
    %cst_9 = arith.constant dense<0.000000e+00> : vector<8x256xf32>
    %14 = tpu.matmul %12, %13, %cst_9 {dimension_numbers = #tpu.dot_dimension_numbers<[1], [0], [0], [1], [0, 0, 1, 1], [], []>} : vector<8x256xbf16>, vector<256x256xbf16>, vector<8x256xf32> -> vector<8x256xf32>
    %c0_10 = arith.constant 0 : index
    %c0_11 = arith.constant 0 : index
    %15 = vector.load %arg5[%c0_10, %c0_11] : memref<1x256xf32, #tpu.memory_space<vmem>>, vector<1x256xf32>
    %16 = vector.broadcast %15 : vector<1x256xf32> to vector<8x256xf32>
    %17 = arith.addf %14, %16 : vector<8x256xf32>
    %cst_12 = arith.constant 0.000000e+00 : f32
    %18 = vector.broadcast %cst_12 : f32 to vector<8x256xf32>
    %19 = arith.cmpf ogt, %17, %18 : vector<8x256xf32>
    %cst_13 = arith.constant 1.000000e-01 : f32
    %20 = vector.broadcast %cst_13 : f32 to vector<8x256xf32>
    %21 = arith.mulf %20, %17 : vector<8x256xf32>
    %22 = arith.select %19, %17, %21 : vector<8x256xi1>, vector<8x256xf32>
    %23 = arith.truncf %22 : vector<8x256xf32> to vector<8x256xbf16>
    %c0_14 = arith.constant 0 : index
    %c0_15 = arith.constant 0 : index
    %24 = vector.load %arg6[%c0_14, %c0_15] : memref<256x64xbf16, #tpu.memory_space<vmem>>, vector<256x64xbf16>
    %cst_16 = arith.constant dense<0.000000e+00> : vector<8x64xf32>
    %25 = tpu.matmul %23, %24, %cst_16 {dimension_numbers = #tpu.dot_dimension_numbers<[1], [0], [0], [1], [0, 0, 1, 1], [], []>} : vector<8x256xbf16>, vector<256x64xbf16>, vector<8x64xf32> -> vector<8x64xf32>
    %c0_17 = arith.constant 0 : index
    %c0_18 = arith.constant 0 : index
    %26 = vector.load %arg7[%c0_17, %c0_18] : memref<1x64xf32, #tpu.memory_space<vmem>>, vector<1x64xf32>
    %27 = vector.broadcast %26 : vector<1x64xf32> to vector<8x64xf32>
    %28 = arith.addf %25, %27 : vector<8x64xf32>
    %c0_19 = arith.constant 0 : index
    %c0_20 = arith.constant 0 : index
    %29 = vector.load %arg8[%c0_19, %c0_20] : memref<8x64xf32, #tpu.memory_space<vmem>>, vector<8x64xf32>
    tpu.vector_store %arg8[%c0_19, %c0_20], %28 {strides = array<i32>} : memref<8x64xf32, #tpu.memory_space<vmem>>, vector<8x64xf32>,
    return
  }
  func.func @transform_0(%arg0: i32) -> (i32, i32) {
    %c0_i32 = arith.constant 0 : i32
    %c0_i32_0 = arith.constant 0 : i32
    return %arg0, %c0_i32 : i32, i32
  }
  func.func @transform_1(%arg0: i32) -> (i32, i32) {
    %c0_i32 = arith.constant 0 : i32
    %c0_i32_0 = arith.constant 0 : i32
    %c0_i32_1 = arith.constant 0 : i32
    return %c0_i32, %c0_i32_0 : i32, i32
  }
  func.func @transform_2(%arg0: i32) -> (i32, i32) {
    %c0_i32 = arith.constant 0 : i32
    %c0_i32_0 = arith.constant 0 : i32
    %c0_i32_1 = arith.constant 0 : i32
    return %c0_i32, %c0_i32_0 : i32, i32
  }
  func.func @transform_3(%arg0: i32) -> (i32, i32) {
    %c0_i32 = arith.constant 0 : i32
    %c0_i32_0 = arith.constant 0 : i32
    %c0_i32_1 = arith.constant 0 : i32
    return %c0_i32, %c0_i32_0 : i32, i32
  }
  func.func @transform_4(%arg0: i32) -> (i32, i32) {
    %c0_i32 = arith.constant 0 : i32
    %c0_i32_0 = arith.constant 0 : i32
    %c0_i32_1 = arith.constant 0 : i32
    return %c0_i32, %c0_i32_0 : i32, i32
  }
  func.func @transform_5(%arg0: i32) -> (i32, i32) {
    %c0_i32 = arith.constant 0 : i32
    %c0_i32_0 = arith.constant 0 : i32
    %c0_i32_1 = arith.constant 0 : i32
    return %c0_i32, %c0_i32_0 : i32, i32
  }
  func.func @transform_6(%arg0: i32) -> (i32, i32) {
    %c0_i32 = arith.constant 0 : i32
    %c0_i32_0 = arith.constant 0 : i32
    %c0_i32_1 = arith.constant 0 : i32
    return %c0_i32, %c0_i32_0 : i32, i32
  }
  func.func @transform_7(%arg0: i32) -> (i32, i32) {
    %c0_i32 = arith.constant 0 : i32
    %c0_i32_0 = arith.constant 0 : i32
    return %arg0, %c0_i32 : i32, i32
  }
}

</mosaic_0001>

<bundles_post_ra>
// kernel: ee_delta_encoder_forward.1
= control target key start
LH: loop header
LB: loop body
LE: loop exit
PB: predicated region body
PF: predicated region fallthrough
CT: control target
= control target key end

     0   :  { %12 = vsyncpa [#allocation3], 0  ;;  %s722_s24 = smov [#allocation2]   ;;  %s838_s0 = inlined_call_operand.vmem [shape: f32[8,16], index: 0, kind: input, shape index: {}]   ;;  %s839_s1 = inlined_call_operand.vmem [shape: bf16[16,256], index: 1, kind: input, shape index: {}]   ;;  %s840_s2 = inlined_call_operand.vmem [shape: f32[1,256], index: 2, kind: input, shape index: {}]   ;;  %s841_s3 = inlined_call_operand.hbm [shape: bf16[256,256], index: 3, kind: input, shape index: {}]   ;;  %s842_s4 = inlined_call_operand.vmem [shape: f32[1,256], index: 4, kind: input, shape index: {}]   ;;  %s843_s5 = inlined_call_operand.vmem [shape: bf16[256,64], index: 5, kind: input, shape index: {}]   ;;  %s844_s6 = inlined_call_operand.vmem [shape: f32[1,64], index: 6, kind: input, shape index: {}]   ;;  %s845_s7 = inlined_call_operand.vmem [shape: f32[8,64], index: 7, kind: output, shape index: {}]  }
   0x1   :  { %s24_s25 = sshll.u32 %s722_s24, 4  ;;  %s25_s25 = int_to_ptr.vmem [resolvable:$true] %s24_s25 }
   0x2   :  { %s708_s26 = scalar_lea.vmem %s25_s25, 4096  ;;  %p713_p1 = scmp.lt.s32.totalorder %s25_s25, %s25_s25 }
   0x3   :  { %p709_p0 = scmp.ne.s32.totalorder %s25_s25, %s708_s26  ;;  %p714_p2 = scmp.lt.s32.totalorder %s708_s26, %s708_s26 }
   0x5   :  { %p715_p3 = por %p714_p2, %p713_p1 }
   0x7   :  { %p716_p4 = pnand %p715_p3, %p709_p0 }
   0x9   :  { %719 = shalt.err (!%p716_p4)
}
   0xa   :  { %s723_s27 = smov 128   ;;  %s724_s28 = smov 8  }
   0xb   :  { %30 = dma.hbm_to_vmem [thread:$0]  %s841_s3, 4096, %s25_s25, [#allocation3], %s723_s27, %s723_s27, %s724_s28  }
   0xc   :  { %720 = dma.done.wait [#allocation3], 4096  }
   0xd   :  { %721 = vsyncadd [#allocation3], 4294963200  ;;  %v725_v0 = vmov 0   ;;  %v633_v1 = vld [vmem:[%s839_s1 + $0x4] ss:$8 sps:$4 sm:$0xff]   ;;  %vm67_vm0 = vcmask 130048   ;;  %v47_v48 = vlaneseq }
   0xe   :  { %103 = vmatprep.mubr.bf16.mxu0 %v725_v0  ;;  %v635_v2 = vld [vmem:[%s839_s1] ss:$8 sps:$4 sm:$0xff]   ;;  %85 = vmatprep.subr.bf16.mxu0 %v633_v1  ;;  %v636_v5 = vld [vmem:[#allocation2 + $0x74] ss:$8 sps:$4 sm:$0xff]   ;;  %v638_v6 = vld [vmem:[#allocation2 + $0x70] ss:$8 sps:$4 sm:$0xff]  }
   0xf   :  { %v41_v3 = vld [vmem:[%s838_s0] sm:$0xff]  ;;  %86 = vmatpush1.bf16.msra.mxu0 %v635_v2  ;;  %324 = vmatprep.subr.bf16.mxu1 %v636_v5  ;;  %v642_v9 = vld [vmem:[#allocation2 + $0x54] ss:$8 sps:$4 sm:$0xff]   ;;  %v644_v10 = vld [vmem:[#allocation2 + $0x50] ss:$8 sps:$4 sm:$0xff]   ;;  %v48_v49 = vshrl.u32 %v47_v48, 7 }
  0x10   :  { %v42_v4 = vpack.c.bf16 %v41_v3, %v41_v3  ;;  %v639_v7 = vld [vmem:[#allocation2 + $0x64] ss:$8 sps:$4 sm:$0xff]   ;;  %325 = vmatpush1.bf16.msra.mxu1 %v638_v6  ;;  %v641_v8 = vld [vmem:[#allocation2 + $0x60] ss:$8 sps:$4 sm:$0xff]   ;;  %v648_v13 = vld [vmem:[#allocation2 + $0x34] ss:$8 sps:$4 sm:$0xff]  }
  0x11   :  { %326 = vmatprep.subr.bf16.mxu1 %v639_v7  ;;  %v645_v11 = vld [vmem:[#allocation2 + $0x44] ss:$8 sps:$4 sm:$0xff]   ;;  %v647_v12 = vld [vmem:[#allocation2 + $0x40] ss:$8 sps:$4 sm:$0xff]   ;;  %v650_v14 = vld [vmem:[#allocation2 + $0x30] ss:$8 sps:$4 sm:$0xff]  }
  0x12   :  { %557 = vmatmul.mubr.msk.bf16.vlgmr.msra.gmra.mxu0 %vm67_vm0, %v42_v4  ;;  %v651_v15 = vld [vmem:[#allocation2 + $0x24] ss:$8 sps:$4 sm:$0xff]   ;;  %v653_v16 = vld [vmem:[#allocation2 + $0x20] ss:$8 sps:$4 sm:$0xff]   ;;  %v654_v17 = vld [vmem:[#allocation2 + $0x14] ss:$8 sps:$4 sm:$0xff]  }
  0x13   :  { %v656_v18 = vld [vmem:[#allocation2 + $0x10] ss:$8 sps:$4 sm:$0xff]   ;;  %v657_v19 = vld [vmem:[#allocation2 + $0x4] ss:$8 sps:$4 sm:$0xff]   ;;  %v659_v20 = vld [vmem:[#allocation2] ss:$8 sps:$4 sm:$0xff]  }
  0x14   :  { %327 = vmatpush1.bf16.msra.mxu1 %v641_v8  ;;  %v660_v21 = vld [vmem:[#allocation2 + $0xf4] ss:$8 sps:$4 sm:$0xff]   ;;  %v662_v22 = vld [vmem:[#allocation2 + $0xf0] ss:$8 sps:$4 sm:$0xff]   ;;  %v663_v23 = vld [vmem:[#allocation2 + $0xe4] ss:$8 sps:$4 sm:$0xff]  }
  0x15   :  { %328 = vmatprep.subr.bf16.mxu1 %v642_v9  ;;  %v665_v24 = vld [vmem:[#allocation2 + $0xe0] ss:$8 sps:$4 sm:$0xff]   ;;  %v666_v25 = vld [vmem:[#allocation2 + $0xd4] ss:$8 sps:$4 sm:$0xff]   ;;  %v668_v26 = vld [vmem:[#allocation2 + $0xd0] ss:$8 sps:$4 sm:$0xff]  }
  0x16   :  { %v669_v27 = vld [vmem:[#allocation2 + $0xc4] ss:$8 sps:$4 sm:$0xff]   ;;  %v671_v28 = vld [vmem:[#allocation2 + $0xc0] ss:$8 sps:$4 sm:$0xff]   ;;  %v672_v29 = vld [vmem:[#allocation2 + $0xb4] ss:$8 sps:$4 sm:$0xff]  }
  0x17   :  { %v674_v30 = vld [vmem:[#allocation2 + $0xb0] ss:$8 sps:$4 sm:$0xff]   ;;  %v675_v31 = vld [vmem:[#allocation2 + $0xa4] ss:$8 sps:$4 sm:$0xff]   ;;  %v677_v32 = vld [vmem:[#allocation2 + $0xa0] ss:$8 sps:$4 sm:$0xff]  }
  0x18   :  { %329 = vmatpush1.bf16.msra.mxu1 %v644_v10  ;;  %v678_v33 = vld [vmem:[#allocation2 + $0x94] ss:$8 sps:$4 sm:$0xff]   ;;  %v680_v34 = vld [vmem:[#allocation2 + $0x90] ss:$8 sps:$4 sm:$0xff]   ;;  %v681_v35 = vld [vmem:[#allocation2 + $0x84] ss:$8 sps:$4 sm:$0xff]  }
  0x19   :  { %330 = vmatprep.subr.bf16.mxu1 %v645_v11  ;;  %v683_v36 = vld [vmem:[#allocation2 + $0x80] ss:$8 sps:$4 sm:$0xff]   ;;  %v684_v37 = vld [vmem:[%s843_s5 + $0x78] sm:$0xff]   ;;  %v686_v39 = vld [vmem:[%s843_s5 + $0x70] sm:$0xff]   ;;  %v49_v50 = vsub.s32 0, %v48_v49  ;;  %v53_v52 = vsub.s32 1, %v48_v49 }
  0x1a   :  { %v685_v38 = vld [vmem:[%s843_s5 + $0x38] sm:$0xff]   ;;  %607 = vmatprep.subr.bf16.mxu0 %v684_v37  ;;  %v687_v40 = vld [vmem:[%s843_s5 + $0x30] sm:$0xff]   ;;  %v688_v41 = vld [vmem:[%s843_s5 + $0x68] sm:$0xff]   ;;  %vm548_vm5 = vcmask 523264  }
  0x1b   :  { %608 = vmatpush3.bf16.msra.mxu0 %v685_v38  ;;  %v689_v42 = vld [vmem:[%s843_s5 + $0x28] sm:$0xff]   ;;  %v690_v43 = vld [vmem:[%s843_s5 + $0x60] sm:$0xff]   ;;  %v692_v45 = vld [vmem:[%s843_s5 + $0x58] sm:$0xff]  }
  0x1c   :  { %331 = vmatpush1.bf16.msra.mxu1 %v647_v12  ;;  %609 = vmatprep.subr.bf16.mxu0 %v686_v39  ;;  %v691_v44 = vld [vmem:[%s843_s5 + $0x20] sm:$0xff]   ;;  %v693_v46 = vld [vmem:[%s843_s5 + $0x18] sm:$0xff]   ;;  %v694_v47 = vld [vmem:[%s843_s5 + $0x50] sm:$0xff]  }
  0x1d   :  { %332 = vmatprep.subr.bf16.mxu1 %v648_v13  ;;  %v45_v51 = vld [vmem:[%s840_s2] sm:$0x3]  ;;  %v695_v3 = vld [vmem:[%s843_s5 + $0x10] sm:$0xff]   ;;  %v696_v4 = vld [vmem:[%s843_s5 + $0x48] sm:$0xff]  }
  0x1e   :  { %v50_v53 = vrot.slane %v45_v51, %v49_v50  ;;  %v54_v54 = vrot.slane %v45_v51, %v53_v52  ;;  %v697_v5 = vld [vmem:[%s843_s5 + $0x8] sm:$0xff]   ;;  %v698_v6 = vld [vmem:[%s843_s5 + $0x40] sm:$0xff]  }
  0x1f   :  { %610 = vmatpush3.bf16.msra.mxu0 %v687_v40  ;;  %v699_v7 = vld [vmem:[%s843_s5] sm:$0xff]  }
  0x20   :  { %333 = vmatpush1.bf16.msra.mxu1 %v650_v14  ;;  %611 = vmatprep.subr.bf16.mxu0 %v688_v41  ;;  %v152_v8 = vld [vmem:[%s842_s4] sm:$0x3] }
  0x21   :  { %334 = vmatprep.subr.bf16.mxu1 %v651_v15  ;;  %v157_v9 = vrot.slane %v152_v8, %v49_v50  ;;  %v161_v10 = vrot.slane %v152_v8, %v53_v52 }
  0x23   :  { %612 = vmatpush3.bf16.msra.mxu0 %v689_v42 }
  0x24   :  { %335 = vmatpush1.bf16.msra.mxu1 %v653_v16  ;;  %613 = vmatprep.subr.bf16.mxu0 %v690_v43 }
  0x25   :  { %336 = vmatprep.subr.bf16.mxu1 %v654_v17 }
  0x27   :  { %614 = vmatpush3.bf16.msra.mxu0 %v691_v44 }
  0x28   :  { %337 = vmatpush1.bf16.msra.mxu1 %v656_v18  ;;  %615 = vmatprep.subr.bf16.mxu0 %v692_v45 }
  0x29   :  { %338 = vmatprep.subr.bf16.mxu1 %v657_v19 }
  0x2b   :  { %616 = vmatpush3.bf16.msra.mxu0 %v693_v46 }
  0x2c   :  { %339 = vmatpush1.bf16.msra.mxu1 %v659_v20  ;;  %617 = vmatprep.subr.bf16.mxu0 %v694_v47 }
  0x2d   :  { %340 = vmatprep.subr.bf16.mxu1 %v660_v21 }
  0x2f   :  { %618 = vmatpush3.bf16.msra.mxu0 %v695_v3 }
  0x30   :  { %341 = vmatpush2.bf16.msra.mxu1 %v662_v22  ;;  %619 = vmatprep.subr.bf16.mxu0 %v696_v4 }
  0x31   :  { %342 = vmatprep.subr.bf16.mxu1 %v663_v23 }
  0x33   :  { %620 = vmatpush3.bf16.msra.mxu0 %v697_v5 }
  0x34   :  { %343 = vmatpush2.bf16.msra.mxu1 %v665_v24  ;;  %621 = vmatprep.subr.bf16.mxu0 %v698_v6  ;;  %v590_v24 = vld [vmem:[%s844_s6] ss:$0 sm:$0xff] }
  0x35   :  { %344 = vmatprep.subr.bf16.mxu1 %v666_v25 }
  0x37   :  { %622 = vmatpush3.bf16.msra.mxu0 %v699_v7 }
  0x38   :  { %345 = vmatpush2.bf16.msra.mxu1 %v668_v26 }
  0x39   :  { %346 = vmatprep.subr.bf16.mxu1 %v669_v27 }
  0x3c   :  { %347 = vmatpush2.bf16.msra.mxu1 %v671_v28 }
  0x3d   :  { %348 = vmatprep.subr.bf16.mxu1 %v672_v29 }
  0x40   :  { %349 = vmatpush2.bf16.msra.mxu1 %v674_v30 }
  0x41   :  { %350 = vmatprep.subr.bf16.mxu1 %v675_v31 }
  0x44   :  { %351 = vmatpush2.bf16.msra.mxu1 %v677_v32 }
  0x45   :  { %352 = vmatprep.subr.bf16.mxu1 %v678_v33 }
  0x48   :  { %353 = vmatpush2.bf16.msra.mxu1 %v680_v34 }
  0x49   :  { %354 = vmatprep.subr.bf16.mxu1 %v681_v35 }
  0x4c   :  { %355 = vmatpush2.bf16.msra.mxu1 %v683_v36 }
  0xd2   :  { %v105_v55 = vpop.f32.mrf.mxu0 }
  0xd3   :  { %v106_v56 = vadd.f32 %v105_v55, %v50_v53 }
  0xd4   :  { %v107_v57 = vpop.f32.mrf.mxu0 }
  0xd5   :  { %vm112_vm1 = vcmp.gt.f32.partialorder %v106_v56, 0.0  ;;  %v114_v58 = vmul.f32 0.1, %v106_v56  ;;  %v108_v59 = vadd.f32 %v107_v57, %v54_v54 }
  0xd6   :  { %v109_v60 = vpop.f32.mrf.mxu0 }
  0xd7   :  { %vm113_vm2 = vcmp.gt.f32.partialorder %v108_v59, 0.0  ;;  %v115_v61 = vmul.f32 0.1, %v108_v59  ;;  %v116_v63 = vsel %vm112_vm1, %v106_v56, %v114_v58 }
  0xd8   :  { %v110_v62 = vpop.f32.mrf.mxu0  ;;  %v118_v2 = vpack.c.bf16 %v116_v63, %v116_v63 }
  0xd9   :  { %v117_v0 = vsel %vm113_vm2, %v108_v59, %v115_v61 }
  0xda   :  { %v119_v1 = vpack.c.bf16 %v117_v0, %v117_v0 }
  0xdc   :  { %356 = vmatprep.mubr.bf16.mxu1 %v119_v1 }
  0xdd   :  { %357 = vmatmul.mubr.bf16.vlgmr.msra.gmra.mxu1 %v118_v2 }
 0x19d   :  { %v358_v11 = vpop.f32.mrf.mxu1 }
 0x19e   :  { %v359_v12 = vadd.f32 %v358_v11, %v157_v9 }
 0x19f   :  { %v360_v13 = vpop.f32.mrf.mxu1 }
 0x1a0   :  { %vm365_vm3 = vcmp.gt.f32.partialorder %v359_v12, 0.0  ;;  %v367_v14 = vmul.f32 0.1, %v359_v12  ;;  %v361_v15 = vadd.f32 %v360_v13, %v161_v10 }
 0x1a1   :  { %v362_v16 = vpop.f32.mrf.mxu1 }
 0x1a2   :  { %vm366_vm4 = vcmp.gt.f32.partialorder %v361_v15, 0.0  ;;  %v368_v17 = vmul.f32 0.1, %v361_v15  ;;  %v369_v18 = vsel %vm365_vm3, %v359_v12, %v367_v14 }
 0x1a3   :  { %v363_v19 = vpop.f32.mrf.mxu1  ;;  %v371_v22 = vpack.c.bf16 %v369_v18, %v369_v18 }
 0x1a4   :  { %v370_v20 = vsel %vm366_vm4, %v361_v15, %v368_v17 }
 0x1a5   :  { %v372_v21 = vpack.c.bf16 %v370_v20, %v370_v20 }
 0x1a7   :  { %540 = vmatprep.mubr.bf16.mxu0 %v372_v21 }
 0x1a8   :  { %541 = vmatmul.mubr.bf16.vlgmr.msra.gmra.mxu0 %v371_v22 }
 0x268   :  { %v623_v23 = vpop.f32.mrf.mxu0 }
 0x26a   :  { %v624_v25 = vpop.f32.mrf.mxu0 }
 0x26b   :  { %v625_v26 = vadd.f32 %v624_v25, %v623_v23 }
 0x26c   :  { %v626_v27 = vpop.f32.mrf.mxu0 }
 0x26d   :  { %v543_v28 = vadd.f32 %v625_v26, %v590_v24 }
 0x26e   :  { %v627_v29 = vpop.f32.mrf.mxu0 }
 0x26f   :  { %549 = vst.msk [vmem:[%s845_s7] sm:$0xff] %vm548_vm5, %v543_v28 }
 0x270   :  { %554 = vsyncpa [#allocation3], 1 }

</bundles_post_ra>
